<compile_context>
chip_gen: v6e
topology: v6e:2x2x1
jax: 0.10.0
libtpu: 0.0.40
codegen_flags: <defaults>
</compile_context>

<pallas_src>
import functools

import jax
import jax.numpy as jnp
from jax.experimental import pallas as pl
from jax.experimental.pallas import tpu as pltpu

_LANE = 128     # lane width (last dim)
_SUBLANE = 8    # sublane width (second-to-last dim, f32)


def _round_up(n, m):
    return ((n + m - 1) // m) * m


def _pad2(a, shape):
    """Zero-pad a 2-D array up to `shape` (top-left aligned)."""
    out = jnp.zeros(shape, a.dtype)
    return out.at[: a.shape[0], : a.shape[1]].set(a)


def _mlp_kernel(x_ref, w1_ref, b1_ref, w2_ref, b2_ref, w3_ref, b3_ref, o_ref):
    # Three MXU matmuls with f32 accumulation; biases/activations kept in f32,
    # activations cast back to the weight dtype (bf16) for the next matmul.
    x = x_ref[...]
    h1 = jnp.dot(x, w1_ref[...], preferred_element_type=jnp.float32) + b1_ref[...]
    h1 = jnp.maximum(h1, 0.0)
    h2 = jnp.dot(h1.astype(w2_ref.dtype), w2_ref[...],
                 preferred_element_type=jnp.float32) + b2_ref[...]
    h2 = jnp.maximum(h2, 0.0)
    h3 = jnp.dot(h2.astype(w3_ref.dtype), w3_ref[...],
                 preferred_element_type=jnp.float32) + b3_ref[...]
    o_ref[...] = h3.astype(o_ref.dtype)


@functools.partial(jax.jit, static_argnames=("tile_b", "compute_dtype"))
def linear_model_forward(x, params, *, tile_b=512, compute_dtype=jnp.bfloat16):
    """x: [B, in_features] float32.  params: dict of w1,b1,w2,b2,w3,b3.

    Returns [B, out_features] float32.
    """
    w1, b1, w2, b2, w3, b3 = (params["w1"], params["b1"], params["w2"],
                              params["b2"], params["w3"], params["b3"])
    B, in_features = x.shape
    hidden_units = w1.shape[1]
    out_features = w3.shape[1]

    # Lane-dense (128-multiple) feature dims; batch padded to the tile size.
    f_in = _round_up(in_features, _LANE)
    f_h = _round_up(hidden_units, _LANE)
    f_out = _round_up(out_features, _LANE)
    tile_b = min(tile_b, _round_up(B, _SUBLANE))
    b_pad = _round_up(B, tile_b)
    grid = (b_pad // tile_b,)

    # Zero-pad + cast MXU operands to bf16 (biases stay f32 for the f32 add).
    x_p = _pad2(x, (b_pad, f_in)).astype(compute_dtype)
    w1_p = _pad2(w1, (f_in, f_h)).astype(compute_dtype)
    w2_p = _pad2(w2, (f_h, f_h)).astype(compute_dtype)
    w3_p = _pad2(w3, (f_h, f_out)).astype(compute_dtype)
    b1_p = _pad2(b1, (1, f_h)).astype(jnp.float32)
    b2_p = _pad2(b2, (1, f_h)).astype(jnp.float32)
    b3_p = _pad2(b3, (1, f_out)).astype(jnp.float32)

    # Weights/biases: same block for every grid step -> VMEM-resident (stationary).
    def _stationary(a):
        return pl.BlockSpec(a.shape, lambda i: (0, 0))

    out_p = pl.pallas_call(
        _mlp_kernel,
        out_shape=jax.ShapeDtypeStruct((b_pad, f_out), jnp.float32),
        grid_spec=pl.GridSpec(
            grid=grid,
            in_specs=[
                pl.BlockSpec((tile_b, f_in), lambda i: (i, 0)),   # x: streamed
                _stationary(w1_p), _stationary(b1_p),
                _stationary(w2_p), _stationary(b2_p),
                _stationary(w3_p), _stationary(b3_p),
            ],
            out_specs=pl.BlockSpec((tile_b, f_out), lambda i: (i, 0)),
        ),
        compiler_params=pltpu.CompilerParams(
            dimension_semantics=("parallel",),   # v7x: split batch tiles over 2 TCs
        ),
    )(x_p, w1_p, b1_p, w2_p, b2_p, w3_p, b3_p)

    return out_p[:B, :out_features]


def init_params(key, in_features, hidden_units, out_features):
    """Deterministic init mirroring nn.Linear shapes (stored transposed)."""
    ks = jax.random.split(key, 6)

    def lin(kw, kb, fan_in, fan_out):
        bound = 1.0 / jnp.sqrt(fan_in)
        w = jax.random.uniform(kw, (fan_in, fan_out), jnp.float32, -bound, bound)
        b = jax.random.uniform(kb, (1, fan_out), jnp.float32, -bound, bound)
        return w, b

    w1, b1 = lin(ks[0], ks[1], in_features, hidden_units)
    w2, b2 = lin(ks[2], ks[3], hidden_units, hidden_units)
    w3, b3 = lin(ks[4], ks[5], hidden_units, out_features)
    return {"w1": w1, "b1": b1, "w2": w2, "b2": b2, "w3": w3, "b3": b3}


def _reference(x, p, compute_dtype):
    """Pure-JAX reference on the same bf16-cast operands (f32 accumulate)."""
    cast = lambda a: a.astype(compute_dtype).astype(jnp.float32)
    h = jnp.maximum(cast(x) @ cast(p["w1"]) + p["b1"], 0.0)
    h = jnp.maximum(cast(h) @ cast(p["w2"]) + p["b2"], 0.0)
    return cast(h) @ cast(p["w3"]) + p["b3"]


if __name__ == "__main__":
    key = jax.random.PRNGKey(0)
    k_x, k_p = jax.random.split(key)

    B, in_features, hidden_units, out_features = 8, 16, 32, 8
    x = jax.random.normal(k_x, (B, in_features), jnp.float32)
    params = init_params(k_p, in_features, hidden_units, out_features)

    out = linear_model_forward(x, params)
    out = jax.block_until_ready(out)

    ref = _reference(x, params, jnp.bfloat16)
    assert out.shape == (B, out_features)
    assert out.dtype == jnp.float32
    assert jnp.allclose(out, ref, atol=2e-3, rtol=2e-3), \
        float(jnp.max(jnp.abs(out - ref)))

    print("KERNEL_OK")
</pallas_src>

<mosaic_0001>
module attributes {stable_mosaic.version = 11 : i64} {
  func.func @_mlp_kernel(%arg0: i32, %arg1: memref<8x128xbf16, #tpu.memory_space<vmem>>, %arg2: memref<128x128xbf16, #tpu.memory_space<vmem>>, %arg3: memref<1x128xf32, #tpu.memory_space<vmem>>, %arg4: memref<128x128xbf16, #tpu.memory_space<vmem>>, %arg5: memref<1x128xf32, #tpu.memory_space<vmem>>, %arg6: memref<128x128xbf16, #tpu.memory_space<vmem>>, %arg7: memref<1x128xf32, #tpu.memory_space<vmem>>, %arg8: memref<8x128xf32, #tpu.memory_space<vmem>>) attributes {dimension_semantics = [#tpu.dimension_semantics<parallel>], iteration_bounds = array<i64: 1>, scalar_prefetch = 0 : i64, scratch_operands = 0 : i64, tpu.core_type = #tpu.core_type<tc>, window_params = [{transform_indices = @transform_0, window_bounds = array<i64: 8, 128>}, {pipeline_mode = #tpu.pipeline_mode<synchronous>, transform_indices = @transform_1, window_bounds = array<i64: 128, 128>}, {pipeline_mode = #tpu.pipeline_mode<synchronous>, transform_indices = @transform_2, window_bounds = array<i64: 1, 128>}, {pipeline_mode = #tpu.pipeline_mode<synchronous>, transform_indices = @transform_3, window_bounds = array<i64: 128, 128>}, {pipeline_mode = #tpu.pipeline_mode<synchronous>, transform_indices = @transform_4, window_bounds = array<i64: 1, 128>}, {pipeline_mode = #tpu.pipeline_mode<synchronous>, transform_indices = @transform_5, window_bounds = array<i64: 128, 128>}, {pipeline_mode = #tpu.pipeline_mode<synchronous>, transform_indices = @transform_6, window_bounds = array<i64: 1, 128>}, {transform_indices = @transform_7, window_bounds = array<i64: 8, 128>}]} {
    %c0 = arith.constant 0 : index
    %c0_0 = arith.constant 0 : index
    %0 = vector.load %arg1[%c0, %c0_0] : memref<8x128xbf16, #tpu.memory_space<vmem>>, vector<8x128xbf16>
    %c0_1 = arith.constant 0 : index
    %c0_2 = arith.constant 0 : index
    %1 = vector.load %arg2[%c0_1, %c0_2] : memref<128x128xbf16, #tpu.memory_space<vmem>>, vector<128x128xbf16>
    %cst = arith.constant dense<0.000000e+00> : vector<8x128xf32>
    %2 = tpu.matmul %0, %1, %cst {dimension_numbers = #tpu.dot_dimension_numbers<[1], [0], [0], [1], [0, 0, 1, 1], [], []>} : vector<8x128xbf16>, vector<128x128xbf16>, vector<8x128xf32> -> vector<8x128xf32>
    %c0_3 = arith.constant 0 : index
    %c0_4 = arith.constant 0 : index
    %3 = vector.load %arg3[%c0_3, %c0_4] : memref<1x128xf32, #tpu.memory_space<vmem>>, vector<1x128xf32>
    %4 = vector.broadcast %3 : vector<1x128xf32> to vector<8x128xf32>
    %5 = arith.addf %2, %4 : vector<8x128xf32>
    %cst_5 = arith.constant 0.000000e+00 : f32
    %6 = vector.broadcast %cst_5 : f32 to vector<8x128xf32>
    %7 = arith.maximumf %5, %6 : vector<8x128xf32>
    %8 = arith.truncf %7 : vector<8x128xf32> to vector<8x128xbf16>
    %c0_6 = arith.constant 0 : index
    %c0_7 = arith.constant 0 : index
    %9 = vector.load %arg4[%c0_6, %c0_7] : memref<128x128xbf16, #tpu.memory_space<vmem>>, vector<128x128xbf16>
    %cst_8 = arith.constant dense<0.000000e+00> : vector<8x128xf32>
    %10 = tpu.matmul %8, %9, %cst_8 {dimension_numbers = #tpu.dot_dimension_numbers<[1], [0], [0], [1], [0, 0, 1, 1], [], []>} : vector<8x128xbf16>, vector<128x128xbf16>, vector<8x128xf32> -> vector<8x128xf32>
    %c0_9 = arith.constant 0 : index
    %c0_10 = arith.constant 0 : index
    %11 = vector.load %arg5[%c0_9, %c0_10] : memref<1x128xf32, #tpu.memory_space<vmem>>, vector<1x128xf32>
    %12 = vector.broadcast %11 : vector<1x128xf32> to vector<8x128xf32>
    %13 = arith.addf %10, %12 : vector<8x128xf32>
    %cst_11 = arith.constant 0.000000e+00 : f32
    %14 = vector.broadcast %cst_11 : f32 to vector<8x128xf32>
    %15 = arith.maximumf %13, %14 : vector<8x128xf32>
    %16 = arith.truncf %15 : vector<8x128xf32> to vector<8x128xbf16>
    %c0_12 = arith.constant 0 : index
    %c0_13 = arith.constant 0 : index
    %17 = vector.load %arg6[%c0_12, %c0_13] : memref<128x128xbf16, #tpu.memory_space<vmem>>, vector<128x128xbf16>
    %cst_14 = arith.constant dense<0.000000e+00> : vector<8x128xf32>
    %18 = tpu.matmul %16, %17, %cst_14 {dimension_numbers = #tpu.dot_dimension_numbers<[1], [0], [0], [1], [0, 0, 1, 1], [], []>} : vector<8x128xbf16>, vector<128x128xbf16>, vector<8x128xf32> -> vector<8x128xf32>
    %c0_15 = arith.constant 0 : index
    %c0_16 = arith.constant 0 : index
    %19 = vector.load %arg7[%c0_15, %c0_16] : memref<1x128xf32, #tpu.memory_space<vmem>>, vector<1x128xf32>
    %20 = vector.broadcast %19 : vector<1x128xf32> to vector<8x128xf32>
    %21 = arith.addf %18, %20 : vector<8x128xf32>
    %c0_17 = arith.constant 0 : index
    %c0_18 = arith.constant 0 : index
    %22 = vector.load %arg8[%c0_17, %c0_18] : memref<8x128xf32, #tpu.memory_space<vmem>>, vector<8x128xf32>
    tpu.vector_store %arg8[%c0_17, %c0_18], %21 {strides = array<i32>} : memref<8x128xf32, #tpu.memory_space<vmem>>, vector<8x128xf32>,
    return
  }
  func.func @transform_0(%arg0: i32) -> (i32, i32) {
    %c0_i32 = arith.constant 0 : i32
    %c0_i32_0 = arith.constant 0 : i32
    return %arg0, %c0_i32 : i32, i32
  }
  func.func @transform_1(%arg0: i32) -> (i32, i32) {
    %c0_i32 = arith.constant 0 : i32
    %c0_i32_0 = arith.constant 0 : i32
    %c0_i32_1 = arith.constant 0 : i32
    return %c0_i32, %c0_i32_0 : i32, i32
  }
  func.func @transform_2(%arg0: i32) -> (i32, i32) {
    %c0_i32 = arith.constant 0 : i32
    %c0_i32_0 = arith.constant 0 : i32
    %c0_i32_1 = arith.constant 0 : i32
    return %c0_i32, %c0_i32_0 : i32, i32
  }
  func.func @transform_3(%arg0: i32) -> (i32, i32) {
    %c0_i32 = arith.constant 0 : i32
    %c0_i32_0 = arith.constant 0 : i32
    %c0_i32_1 = arith.constant 0 : i32
    return %c0_i32, %c0_i32_0 : i32, i32
  }
  func.func @transform_4(%arg0: i32) -> (i32, i32) {
    %c0_i32 = arith.constant 0 : i32
    %c0_i32_0 = arith.constant 0 : i32
    %c0_i32_1 = arith.constant 0 : i32
    return %c0_i32, %c0_i32_0 : i32, i32
  }
  func.func @transform_5(%arg0: i32) -> (i32, i32) {
    %c0_i32 = arith.constant 0 : i32
    %c0_i32_0 = arith.constant 0 : i32
    %c0_i32_1 = arith.constant 0 : i32
    return %c0_i32, %c0_i32_0 : i32, i32
  }
  func.func @transform_6(%arg0: i32) -> (i32, i32) {
    %c0_i32 = arith.constant 0 : i32
    %c0_i32_0 = arith.constant 0 : i32
    %c0_i32_1 = arith.constant 0 : i32
    return %c0_i32, %c0_i32_0 : i32, i32
  }
  func.func @transform_7(%arg0: i32) -> (i32, i32) {
    %c0_i32 = arith.constant 0 : i32
    %c0_i32_0 = arith.constant 0 : i32
    return %arg0, %c0_i32 : i32, i32
  }
}

</mosaic_0001>

<bundles_post_ra>
// kernel: linear_model_forward.1
= control target key start
LH: loop header
LB: loop body
LE: loop exit
PB: predicated region body
PF: predicated region fallthrough
CT: control target
= control target key end

     0   :  { %v544_v1 = vmov 0.0   ;;  %vm545_vm0 = vmmov 0   ;;  %s704_s0 = inlined_call_operand.vmem [shape: bf16[8,128], index: 0, kind: input, shape index: {}]   ;;  %s705_s1 = inlined_call_operand.vmem [shape: bf16[128,128], index: 1, kind: input, shape index: {}]   ;;  %s706_s2 = inlined_call_operand.vmem [shape: f32[1,128], index: 2, kind: input, shape index: {}]   ;;  %s707_s3 = inlined_call_operand.vmem [shape: bf16[128,128], index: 3, kind: input, shape index: {}]   ;;  %s708_s4 = inlined_call_operand.vmem [shape: f32[1,128], index: 4, kind: input, shape index: {}]   ;;  %s709_s5 = inlined_call_operand.vmem [shape: bf16[128,128], index: 5, kind: input, shape index: {}]   ;;  %s710_s6 = inlined_call_operand.vmem [shape: f32[1,128], index: 6, kind: input, shape index: {}]   ;;  %s711_s7 = inlined_call_operand.hbm [shape: f32[8,128], index: 7, kind: output, shape index: {}]  }
   0x1   :  { %v498_v0 = vld [vmem:[%s705_s1 + $0x38] sm:$0xff]   ;;  %435 = vmatprep.subr.bf16.mxu0 %v544_v1  ;;  %455 = vmatprep.subr.bf16.mxu1 %v544_v1  ;;  %v499_v2 = vld [vmem:[%s705_s1 + $0x30] sm:$0xff]   ;;  %v500_v3 = vld [vmem:[%s705_s1 + $0x28] sm:$0xff]  }
   0x2   :  { %436 = vmatpush3.bf16.msra.mxu0 %v498_v0  ;;  %451 = vmatprep.mubr.msk.bf16.mxu0 %vm545_vm0, %v544_v1  ;;  %v506_v4 = vld [vmem:[%s707_s3 + $0x38] sm:$0xff]   ;;  %v501_v5 = vld [vmem:[%s705_s1 + $0x20] sm:$0xff]   ;;  %v507_v6 = vld [vmem:[%s707_s3 + $0x30] sm:$0xff]  }
   0x3   :  { %437 = vmatprep.subr.bf16.mxu0 %v544_v1  ;;  %471 = vmatprep.mubr.msk.bf16.mxu1 %vm545_vm0, %v544_v1  ;;  %v502_v7 = vld [vmem:[%s705_s1 + $0x18] sm:$0xff]   ;;  %v508_v8 = vld [vmem:[%s707_s3 + $0x28] sm:$0xff]   ;;  %v503_v9 = vld [vmem:[%s705_s1 + $0x10] sm:$0xff]  }
   0x4   :  { %456 = vmatpush3.bf16.msra.mxu1 %v506_v4  ;;  %v509_v10 = vld [vmem:[%s707_s3 + $0x20] sm:$0xff]  }
   0x5   :  { %457 = vmatprep.subr.bf16.mxu1 %v544_v1 }
   0x6   :  { %438 = vmatpush3.bf16.msra.mxu0 %v499_v2 }
   0x7   :  { %439 = vmatprep.subr.bf16.mxu0 %v544_v1 }
   0x8   :  { %458 = vmatpush3.bf16.msra.mxu1 %v507_v6 }
   0x9   :  { %459 = vmatprep.subr.bf16.mxu1 %v544_v1 }
   0xa   :  { %440 = vmatpush3.bf16.msra.mxu0 %v500_v3 }
   0xb   :  { %441 = vmatprep.subr.bf16.mxu0 %v544_v1 }
   0xc   :  { %460 = vmatpush3.bf16.msra.mxu1 %v508_v8 }
   0xd   :  { %461 = vmatprep.subr.bf16.mxu1 %v544_v1 }
   0xe   :  { %442 = vmatpush3.bf16.msra.mxu0 %v501_v5 }
   0xf   :  { %443 = vmatprep.subr.bf16.mxu0 %v544_v1 }
  0x12   :  { %444 = vmatpush3.bf16.msra.mxu0 %v502_v7 }
  0x13   :  { %445 = vmatprep.subr.bf16.mxu0 %v544_v1 }
  0x14   :  { %12 = vsyncpa [#allocation3], 0  ;;  %v504_v11 = vld [vmem:[%s705_s1 + $0x8] sm:$0xff]   ;;  %462 = vmatpush3.bf16.msra.mxu1 %v509_v10  ;;  %v510_v12 = vld [vmem:[%s707_s3 + $0x18] sm:$0xff]   ;;  %s546_s30 = smov [#allocation2]  }
  0x15   :  { %463 = vmatprep.subr.bf16.mxu1 %v544_v1  ;;  %v505_v13 = vld [vmem:[%s705_s1] sm:$0xff]   ;;  %v511_v14 = vld [vmem:[%s707_s3 + $0x10] sm:$0xff]   ;;  %v512_v16 = vld [vmem:[%s707_s3 + $0x8] sm:$0xff]   ;;  %s373_s1 = sshll.u32 %s546_s30, 4  ;;  %s374_s1 = int_to_ptr.vmem [resolvable:$true] %s373_s1 }
  0x16   :  { %446 = vmatpush3.bf16.msra.mxu0 %v503_v9  ;;  %v28_v15 = vld [vmem:[%s704_s0] sm:$0xf]  ;;  %v514_v18 = vld [vmem:[%s709_s5 + $0x38] sm:$0xff]   ;;  %v515_v19 = vld [vmem:[%s709_s5 + $0x30] sm:$0xff]   ;;  %p527_p1 = scmp.lt.s32.totalorder %s374_s1, %s374_s1 }
  0x17   :  { %447 = vmatprep.subr.bf16.mxu0 %v544_v1  ;;  %v513_v17 = vld [vmem:[%s707_s3] sm:$0xff]   ;;  %v516_v20 = vld [vmem:[%s709_s5 + $0x28] sm:$0xff]   ;;  %v518_v22 = vld [vmem:[%s709_s5 + $0x18] sm:$0xff]  }
  0x18   :  { %464 = vmatpush3.bf16.msra.mxu1 %v510_v12  ;;  %v517_v21 = vld [vmem:[%s709_s5 + $0x20] sm:$0xff]   ;;  %v519_v23 = vld [vmem:[%s709_s5 + $0x10] sm:$0xff]   ;;  %v520_v32 = vld [vmem:[%s709_s5 + $0x8] sm:$0xff]  }
  0x19   :  { %465 = vmatprep.subr.bf16.mxu1 %v544_v1  ;;  %v381_v24 = vld [vmem:[%s706_s2] ss:$0 sm:$0xff] }
  0x1a   :  { %448 = vmatpush3.bf16.msra.mxu0 %v504_v11  ;;  %v521_v33 = vld [vmem:[%s709_s5] sm:$0xff]  }
  0x1b   :  { %449 = vmatprep.subr.bf16.mxu0 %v544_v1  ;;  %v390_v34 = vld [vmem:[%s708_s4] ss:$0 sm:$0xff]  ;;  %s522_s4 = scalar_lea.vmem %s374_s1, 128 }
  0x1c   :  { %466 = vmatpush3.bf16.msra.mxu1 %v511_v14  ;;  %v399_v42 = vld [vmem:[%s710_s6] ss:$0 sm:$0xff]  ;;  %p523_p0 = scmp.ne.s32.totalorder %s374_s1, %s522_s4  ;;  %p528_p2 = scmp.lt.s32.totalorder %s522_s4, %s522_s4 }
  0x1d   :  { %467 = vmatprep.subr.bf16.mxu1 %v544_v1 }
  0x1e   :  { %450 = vmatpush3.bf16.msra.mxu0 %v505_v13  ;;  %p529_p3 = por %p528_p2, %p527_p1 }
  0x1f   :  { %475 = vmatprep.subr.bf16.mxu0 %v544_v1 }
  0x20   :  { %468 = vmatpush3.bf16.msra.mxu1 %v512_v16  ;;  %p530_p4 = pnand %p529_p3, %p523_p0 }
  0x21   :  { %452 = vmatmul.mubr.bf16.vlgmr.msra.gmra.mxu0 %v28_v15  ;;  %469 = vmatprep.subr.bf16.mxu1 %v544_v1 }
  0x22   :  { %491 = vmatprep.mubr.msk.bf16.mxu0 %vm545_vm0, %v544_v1  ;;  %476 = vmatpush3.bf16.msra.mxu0 %v514_v18 }
  0x23   :  { %477 = vmatprep.subr.bf16.mxu0 %v544_v1 }
  0x24   :  { %470 = vmatpush3.bf16.msra.mxu1 %v513_v17 }
  0x26   :  { %478 = vmatpush3.bf16.msra.mxu0 %v515_v19 }
  0x27   :  { %479 = vmatprep.subr.bf16.mxu0 %v544_v1 }
  0x2a   :  { %480 = vmatpush3.bf16.msra.mxu0 %v516_v20 }
  0x2b   :  { %481 = vmatprep.subr.bf16.mxu0 %v544_v1 }
  0x2e   :  { %482 = vmatpush3.bf16.msra.mxu0 %v517_v21 }
  0x2f   :  { %483 = vmatprep.subr.bf16.mxu0 %v544_v1 }
  0x32   :  { %484 = vmatpush3.bf16.msra.mxu0 %v518_v22 }
  0x33   :  { %485 = vmatprep.subr.bf16.mxu0 %v544_v1 }
  0x36   :  { %486 = vmatpush3.bf16.msra.mxu0 %v519_v23 }
  0x37   :  { %487 = vmatprep.subr.bf16.mxu0 %v544_v1 }
  0x3a   :  { %488 = vmatpush3.bf16.msra.mxu0 %v520_v32 }
  0x3b   :  { %489 = vmatprep.subr.bf16.mxu0 %v544_v1 }
  0x3e   :  { %490 = vmatpush3.bf16.msra.mxu0 %v521_v33 }
  0xe1   :  { %v134_v25 = vpop.f32.mrf.mxu0 }
  0xe2   :  { %v135_v26 = vadd.f32 %v381_v24, %v134_v25 }
  0xe3   :  { %v453_v27 = vpop.f32.mrf.mxu0 }
  0xe4   :  { %v140_v28 = vmax.f32 %v135_v26, 0.0 }
  0xe5   :  { %v137_v29 = vpop.f32.mrf.mxu0 }
  0xe6   :  { %v141_v30 = vpack.c.bf16 %v140_v28, %v140_v28 }
  0xe7   :  { %v454_v31 = vpop.f32.mrf.mxu0 }
  0xe8   :  { %472 = vmatmul.mubr.bf16.vlgmr.msra.gmra.mxu1 %v141_v30 }
 0x1a8   :  { %v247_v35 = vpop.f32.mrf.mxu1 }
 0x1a9   :  { %v248_v36 = vadd.f32 %v390_v34, %v247_v35 }
 0x1aa   :  { %v473_v37 = vpop.f32.mrf.mxu1 }
 0x1ab   :  { %v253_v38 = vmax.f32 %v248_v36, 0.0 }
 0x1ac   :  { %v250_v39 = vpop.f32.mrf.mxu1 }
 0x1ad   :  { %v254_v40 = vpack.c.bf16 %v253_v38, %v253_v38 }
 0x1ae   :  { %v474_v41 = vpop.f32.mrf.mxu1 }
 0x1af   :  { %492 = vmatmul.mubr.bf16.vlgmr.msra.gmra.mxu0 %v254_v40 }
 0x26f   :  { %v360_v43 = vpop.f32.mrf.mxu0 }
 0x270   :  { %v361_v44 = vadd.f32 %v399_v42, %v360_v43 }
 0x271   :  { %v493_v45 = vpop.f32.mrf.mxu0 }
 0x272   :  { %366 = vst [vmem:[#allocation2] sm:$0xff] %v361_v44 }
 0x273   :  { %v363_v46 = vpop.f32.mrf.mxu0 }
 0x274   :  { %533 = shalt.err (!%p530_p4)
}
 0x275   :  { %376 = dma.vmem_to_hbm [thread:$0]  %s374_s1, 128, %s711_s7, [#allocation3]   ;;  %v494_v47 = vpop.f32.mrf.mxu0 }
 0x276   :  { %542 = dma.done.wait [#allocation3], 128  }
 0x277   :  { %543 = vsyncadd [#allocation3], 4294967168 }
 0x278   :  { %380 = vsyncpa [#allocation3], 1 }

</bundles_post_ra>
